<compile_context>
chip_gen: v7x
topology: tpu7x:2x2x1
jax: 0.10.0
libtpu: 0.0.40
codegen_flags: <defaults>
</compile_context>

<pallas_src>
import jax
import jax.numpy as jnp
from jax.experimental import pallas as pl
from jax.experimental.pallas import tpu as pltpu


LANE = 128
MAX_TILE = 512                   # 256-512 per the perf review (256 already fine on v5e)
MAX_FULL_COLS = 2048             # below this, use a single full-width column tile
VMEM_LIMIT = 32 * 1024 * 1024    # few-MiB actual usage; safe headroom on v7x (64 MiB)


def _round_up(x, m):
    return (x + m - 1) // m * m


def _pick_tile(n, step, max_tile):
    """Largest divisor of n that is a multiple of `step` and <= max_tile."""
    best = step
    t = step
    while t <= min(n, max_tile):
        if n % t == 0:
            best = t
        t += step
    return best


def _const_spec(shape):
    """Weight operand: same block every grid step -> single-buffer it (saves VMEM)."""
    nd = len(shape)
    return pl.BlockSpec(shape, lambda b, r, _nd=nd: (0,) * _nd,
                        pipeline_mode=pl.Buffered(1))


def _proj_kernel(x_ref, wmT_ref, bm_ref, whT_ref, bh_ref, wwa_ref,
                 mod_ref, wproj_ref):
    """One (batch tile, token-row tile) block per grid step.

    x_ref    : (Bt, TR, Dp) bf16   token encodings
    wmT_ref  : (Dp, Ha)     bf16   modifier Linear weight, pre-transposed + padded
    bm_ref   : (1, Ha)      f32    modifier bias (column H holds the constant 1.0)
    whT_ref  : (Dp, Ha)     bf16   head Linear weight, pre-transposed + padded
    bh_ref   : (1, Ha)      f32    head bias
    wwa_ref  : (Ha, Ha)     bf16   augmented biaffine weight [W_bi^T | b_bi^T]
    mod_ref  : (Bt, TR, Ha) bf16   relu(x @ W_mod^T + b_mod)  (+ constant-1 column)
    wproj_ref: (Bt, TR, Ha) bf16   relu(x @ W_head^T + b_head) @ [W_bi^T | b_bi^T]
    """
    Bt, TR, Dp = x_ref.shape

    # Flatten (batch tile, seq tile) so the projection matmuls fill >= 256 MXU rows.
    x = x_ref[...].reshape(Bt * TR, Dp)

    mod = jnp.maximum(
        jnp.dot(x, wmT_ref[...], preferred_element_type=jnp.float32) + bm_ref[...],
        0.0)                                              # (Bt*TR, Ha) f32
    head = jnp.maximum(
        jnp.dot(x, whT_ref[...], preferred_element_type=jnp.float32) + bh_ref[...],
        0.0).astype(jnp.bfloat16)                         # (Bt*TR, Ha) bf16
    # One MXU call produces [head @ W_bi^T | head @ b_bi^T] (bias folded in wwa).
    wproj = jnp.dot(head, wwa_ref[...], preferred_element_type=jnp.float32)

    for bt in range(Bt):                                  # Bt is a small static constant
        rows = slice(bt * TR, (bt + 1) * TR)
        mod_ref[bt] = mod[rows].astype(jnp.bfloat16)
        wproj_ref[bt] = wproj[rows].astype(jnp.bfloat16)


def _score_kernel(mod_ref, wprojT_ref, o_ref):
    """scores tile = mod tile @ wprojT tile (plain NN matmul, no transposes).

    mod_ref   : (1, TM, Ha) bf16   modifier-row tile
    wprojT_ref: (1, Ha, TN) bf16   pre-transposed head-column tile
    o_ref     : (1, TM, TN) out    scores tile
    """
    o_ref[0] = jnp.dot(mod_ref[0], wprojT_ref[0],
                       preferred_element_type=jnp.float32).astype(o_ref.dtype)


def biaffine_edge_scorer(x, params, out_dtype=jnp.float32):
    """x: (B, S, D) float32.  params: dict of weights in PyTorch nn.Linear layout.

    Returns (B, S, S) scores in `out_dtype` (pass jnp.bfloat16 for write-bound
    large-S workloads).  Dropout layers are identity (eval-mode semantics).
    """
    B, S, D = x.shape
    H = params["W_head"].shape[0]
    f32 = jnp.float32

    Dp = _round_up(D, LANE)            # padded bilstm_out (contraction dim)
    Ha = _round_up(H + 1, LANE)        # padded hidden (+1 column for the folded bias)
    Sc = _round_up(S, LANE)            # head/column dim: lane-dense output stores

    # Modifier-row dim: only sublane alignment is needed -> pad to 16, not 128.
    # For large S fall back to Sc so row tiles divide exactly (<= 127 wasted rows).
    Sor = _round_up(S, 16) if _round_up(S, 16) <= MAX_TILE else Sc
    TM = _pick_tile(Sor, 16, MAX_TILE)                       # modifier-row tile
    TN = Sc if Sc <= MAX_FULL_COLS else _pick_tile(Sc, 128, MAX_TILE)  # head-col tile

    # ---- host-side repacking of the weights (one-time cost) --------------------
    x_p = jnp.zeros((B, Sc, Dp), f32).at[:, :S, :D].set(x).astype(jnp.bfloat16)
    wmT = jnp.zeros((Dp, Ha), f32).at[:D, :H].set(params["W_mod"].T).astype(jnp.bfloat16)
    bm = jnp.zeros((1, Ha), f32).at[0, :H].set(params["b_mod"]).at[0, H].set(1.0)
    whT = jnp.zeros((Dp, Ha), f32).at[:D, :H].set(params["W_head"].T).astype(jnp.bfloat16)
    bh = jnp.zeros((1, Ha), f32).at[0, :H].set(params["b_head"])
    # Augmented biaffine weight: columns [0:H] = W_bi^T, column H = b_bi^T.
    wwa = (jnp.zeros((Ha, Ha), f32)
           .at[:H, :H].set(params["W_bi"].T)
           .at[:H, H].set(params["b_bi"][0])
           .astype(jnp.bfloat16))

    # ---- phase 1: per-token projections (each token processed exactly once) ----
    TR = _pick_tile(Sc, 16, MAX_TILE)          # token-row tile of the projection pass
    target_bt = max(1, 256 // TR)              # aim for >= 256 MXU rows per step
    Bt = 1
    for d in range(min(B, target_bt), 0, -1):
        if B % d == 0:                         # Bt always divides B: no padded batches
            Bt = d
            break

    mod, wproj = pl.pallas_call(
        _proj_kernel,
        out_shape=(jax.ShapeDtypeStruct((B, Sc, Ha), jnp.bfloat16),
                   jax.ShapeDtypeStruct((B, Sc, Ha), jnp.bfloat16)),
        grid_spec=pltpu.PrefetchScalarGridSpec(
            num_scalar_prefetch=0,
            grid=(B // Bt, Sc // TR),
            in_specs=[
                pl.BlockSpec((Bt, TR, Dp), lambda b, r: (b, r, 0)),   # token rows
                _const_spec((Dp, Ha)),   # wmT
                _const_spec((1, Ha)),    # bm (f32, carries the constant-1 column)
                _const_spec((Dp, Ha)),   # whT
                _const_spec((1, Ha)),    # bh (f32)
                _const_spec((Ha, Ha)),   # wwa = [W_bi^T | b_bi^T]
            ],
            out_specs=(pl.BlockSpec((Bt, TR, Ha), lambda b, r: (b, r, 0)),
                       pl.BlockSpec((Bt, TR, Ha), lambda b, r: (b, r, 0))),
        ),
        compiler_params=pltpu.CompilerParams(
            dimension_semantics=("parallel", "parallel"),
            vmem_limit_bytes=VMEM_LIMIT,
        ),
    )(x_p, wmT, bm, whT, bh, wwa)

    # One-time layout plumbing (plain XLA): (B, Sc, Ha) -> (B, Ha, Sc) so the score
    # kernel runs a plain NN matmul with no per-tile transposes (no vxpose in the loop).
    wprojT = jnp.swapaxes(wproj, 1, 2)

    # ---- phase 2: tiled batched matmul for the (B, Sor, Sc) score matrix -------
    out = pl.pallas_call(
        _score_kernel,
        out_shape=jax.ShapeDtypeStruct((B, Sor, Sc), out_dtype),
        grid_spec=pltpu.PrefetchScalarGridSpec(
            num_scalar_prefetch=0,
            grid=(B, Sor // TM, Sc // TN),
            in_specs=[
                pl.BlockSpec((1, TM, Ha), lambda b, r, c: (b, r, 0)),  # modifier rows
                pl.BlockSpec((1, Ha, TN), lambda b, r, c: (b, 0, c)),  # head columns
            ],
            out_specs=pl.BlockSpec((1, TM, TN), lambda b, r, c: (b, r, c)),
        ),
        compiler_params=pltpu.CompilerParams(
            dimension_semantics=("parallel", "parallel", "parallel"),
            vmem_limit_bytes=VMEM_LIMIT,
        ),
    )(mod, wprojT)

    if Sor == S and Sc == S:
        return out                    # already unpadded: skip the slice copy
    return out[:, :S, :S]


def reference(x, params):
    """Plain-JAX float32 reference mirroring the PyTorch forward (eval mode).

    (The trailing .squeeze() of the PyTorch module is a no-op for B > 1, S > 1.)
    """
    head = jnp.maximum(x @ params["W_head"].T + params["b_head"], 0.0)
    mod = jnp.maximum(x @ params["W_mod"].T + params["b_mod"], 0.0)
    biaffine_W = jnp.einsum("bsh,kh->bsk", head, params["W_bi"])   # W(MLP_head)
    scores = jnp.einsum("bih,bjh->bij", mod, biaffine_W)           # mod @ W(head)^T
    biaffine_b = (head @ params["b_bi"].T).transpose(0, 2, 1)      # (B, 1, S)
    return scores + biaffine_b


if __name__ == "__main__":
    B, S = 2, 8
    bilstm_out, hidden_dim = 32, 32

    key = jax.random.PRNGKey(0)
    k0, k1, k2, k3, k4, k5, k6 = jax.random.split(key, 7)

    params = {
        "W_head": 0.1 * jax.random.normal(k1, (hidden_dim, bilstm_out), jnp.float32),
        "b_head": 0.1 * jax.random.normal(k2, (hidden_dim,), jnp.float32),
        "W_mod": 0.1 * jax.random.normal(k3, (hidden_dim, bilstm_out), jnp.float32),
        "b_mod": 0.1 * jax.random.normal(k4, (hidden_dim,), jnp.float32),
        "W_bi": 0.1 * jax.random.normal(k5, (hidden_dim, hidden_dim), jnp.float32),
        "b_bi": 0.1 * jax.random.normal(k6, (1, hidden_dim), jnp.float32),
    }

    x = jax.random.normal(k0, (B, S, bilstm_out), jnp.float32)

    scores = biaffine_edge_scorer(x, params)
    jax.block_until_ready(scores)

    ref = reference(x, params)
    assert scores.shape == (B, S, S), scores.shape
    # bf16 operands / f32 accumulation -> looser tolerance vs the f32 reference.
    assert jnp.allclose(scores, ref, atol=5e-2, rtol=5e-2), "mismatch vs f32 reference"

    print("KERNEL_OK")
</pallas_src>

<mosaic_0001>
module attributes {stable_mosaic.version = 11 : i64} {
  func.func @_proj_kernel(%arg0: i32, %arg1: i32, %arg2: memref<2x128x128xbf16, #tpu.memory_space<vmem>>, %arg3: memref<128x128xbf16, #tpu.memory_space<vmem>>, %arg4: memref<1x128xf32, #tpu.memory_space<vmem>>, %arg5: memref<128x128xbf16, #tpu.memory_space<vmem>>, %arg6: memref<1x128xf32, #tpu.memory_space<vmem>>, %arg7: memref<128x128xbf16, #tpu.memory_space<vmem>>, %arg8: memref<2x128x128xbf16, #tpu.memory_space<vmem>>, %arg9: memref<2x128x128xbf16, #tpu.memory_space<vmem>>) attributes {dimension_semantics = [#tpu.dimension_semantics<parallel>, #tpu.dimension_semantics<parallel>], iteration_bounds = array<i64: 1, 1>, scalar_prefetch = 0 : i64, scratch_operands = 0 : i64, tpu.core_type = #tpu.core_type<tc>, window_params = [{transform_indices = @transform_0, window_bounds = array<i64: 2, 128, 128>}, {pipeline_mode = #tpu.pipeline_mode<synchronous>, transform_indices = @transform_1, window_bounds = array<i64: 128, 128>}, {pipeline_mode = #tpu.pipeline_mode<synchronous>, transform_indices = @transform_2, window_bounds = array<i64: 1, 128>}, {pipeline_mode = #tpu.pipeline_mode<synchronous>, transform_indices = @transform_3, window_bounds = array<i64: 128, 128>}, {pipeline_mode = #tpu.pipeline_mode<synchronous>, transform_indices = @transform_4, window_bounds = array<i64: 1, 128>}, {pipeline_mode = #tpu.pipeline_mode<synchronous>, transform_indices = @transform_5, window_bounds = array<i64: 128, 128>}, {transform_indices = @transform_6, window_bounds = array<i64: 2, 128, 128>}, {transform_indices = @transform_7, window_bounds = array<i64: 2, 128, 128>}]} {
    %c0 = arith.constant 0 : index
    %c0_0 = arith.constant 0 : index
    %c0_1 = arith.constant 0 : index
    %0 = vector.load %arg2[%c0, %c0_0, %c0_1] : memref<2x128x128xbf16, #tpu.memory_space<vmem>>, vector<2x128x128xbf16>
    %1 = vector.shape_cast %0 : vector<2x128x128xbf16> to vector<256x128xbf16>
    %c0_2 = arith.constant 0 : index
    %c0_3 = arith.constant 0 : index
    %2 = vector.load %arg3[%c0_2, %c0_3] : memref<128x128xbf16, #tpu.memory_space<vmem>>, vector<128x128xbf16>
    %cst = arith.constant dense<0.000000e+00> : vector<256x128xf32>
    %3 = tpu.matmul %1, %2, %cst {dimension_numbers = #tpu.dot_dimension_numbers<[1], [0], [0], [1], [0, 0, 1, 1], [], []>} : vector<256x128xbf16>, vector<128x128xbf16>, vector<256x128xf32> -> vector<256x128xf32>
    %c0_4 = arith.constant 0 : index
    %c0_5 = arith.constant 0 : index
    %4 = vector.load %arg4[%c0_4, %c0_5] : memref<1x128xf32, #tpu.memory_space<vmem>>, vector<1x128xf32>
    %5 = vector.broadcast %4 : vector<1x128xf32> to vector<256x128xf32>
    %6 = arith.addf %3, %5 : vector<256x128xf32>
    %cst_6 = arith.constant 0.000000e+00 : f32
    %7 = vector.broadcast %cst_6 : f32 to vector<256x128xf32>
    %8 = arith.maximumf %6, %7 : vector<256x128xf32>
    %c0_7 = arith.constant 0 : index
    %c0_8 = arith.constant 0 : index
    %9 = vector.load %arg5[%c0_7, %c0_8] : memref<128x128xbf16, #tpu.memory_space<vmem>>, vector<128x128xbf16>
    %cst_9 = arith.constant dense<0.000000e+00> : vector<256x128xf32>
    %10 = tpu.matmul %1, %9, %cst_9 {dimension_numbers = #tpu.dot_dimension_numbers<[1], [0], [0], [1], [0, 0, 1, 1], [], []>} : vector<256x128xbf16>, vector<128x128xbf16>, vector<256x128xf32> -> vector<256x128xf32>
    %c0_10 = arith.constant 0 : index
    %c0_11 = arith.constant 0 : index
    %11 = vector.load %arg6[%c0_10, %c0_11] : memref<1x128xf32, #tpu.memory_space<vmem>>, vector<1x128xf32>
    %12 = vector.broadcast %11 : vector<1x128xf32> to vector<256x128xf32>
    %13 = arith.addf %10, %12 : vector<256x128xf32>
    %cst_12 = arith.constant 0.000000e+00 : f32
    %14 = vector.broadcast %cst_12 : f32 to vector<256x128xf32>
    %15 = arith.maximumf %13, %14 : vector<256x128xf32>
    %16 = arith.truncf %15 : vector<256x128xf32> to vector<256x128xbf16>
    %c0_13 = arith.constant 0 : index
    %c0_14 = arith.constant 0 : index
    %17 = vector.load %arg7[%c0_13, %c0_14] : memref<128x128xbf16, #tpu.memory_space<vmem>>, vector<128x128xbf16>
    %cst_15 = arith.constant dense<0.000000e+00> : vector<256x128xf32>
    %18 = tpu.matmul %16, %17, %cst_15 {dimension_numbers = #tpu.dot_dimension_numbers<[1], [0], [0], [1], [0, 0, 1, 1], [], []>} : vector<256x128xbf16>, vector<128x128xbf16>, vector<256x128xf32> -> vector<256x128xf32>
    %19 = vector.extract_strided_slice %8 {offsets = [0, 0], sizes = [128, 128], strides = [1, 1]} : vector<256x128xf32> to vector<128x128xf32>
    %20 = arith.truncf %19 : vector<128x128xf32> to vector<128x128xbf16>
    %c0_16 = arith.constant 0 : index
    %c0_17 = arith.constant 0 : index
    %c0_18 = arith.constant 0 : index
    %21 = vector.load %arg8[%c0_16, %c0_17, %c0_18] : memref<2x128x128xbf16, #tpu.memory_space<vmem>>, vector<1x128x128xbf16>
    %22 = vector.shape_cast %21 : vector<1x128x128xbf16> to vector<128x128xbf16>
    %23 = vector.shape_cast %20 : vector<128x128xbf16> to vector<1x128x128xbf16>
    tpu.vector_store %arg8[%c0_16, %c0_17, %c0_18], %23 {strides = array<i32>} : memref<2x128x128xbf16, #tpu.memory_space<vmem>>, vector<1x128x128xbf16>,
    %24 = vector.extract_strided_slice %18 {offsets = [0, 0], sizes = [128, 128], strides = [1, 1]} : vector<256x128xf32> to vector<128x128xf32>
    %25 = arith.truncf %24 : vector<128x128xf32> to vector<128x128xbf16>
    %c0_19 = arith.constant 0 : index
    %c0_20 = arith.constant 0 : index
    %c0_21 = arith.constant 0 : index
    %26 = vector.load %arg9[%c0_19, %c0_20, %c0_21] : memref<2x128x128xbf16, #tpu.memory_space<vmem>>, vector<1x128x128xbf16>
    %27 = vector.shape_cast %26 : vector<1x128x128xbf16> to vector<128x128xbf16>
    %28 = vector.shape_cast %25 : vector<128x128xbf16> to vector<1x128x128xbf16>
    tpu.vector_store %arg9[%c0_19, %c0_20, %c0_21], %28 {strides = array<i32>} : memref<2x128x128xbf16, #tpu.memory_space<vmem>>, vector<1x128x128xbf16>,
    %29 = vector.extract_strided_slice %8 {offsets = [128, 0], sizes = [128, 128], strides = [1, 1]} : vector<256x128xf32> to vector<128x128xf32>
    %30 = arith.truncf %29 : vector<128x128xf32> to vector<128x128xbf16>
    %c1 = arith.constant 1 : index
    %c0_22 = arith.constant 0 : index
    %c0_23 = arith.constant 0 : index
    %31 = vector.load %arg8[%c1, %c0_22, %c0_23] : memref<2x128x128xbf16, #tpu.memory_space<vmem>>, vector<1x128x128xbf16>
    %32 = vector.shape_cast %31 : vector<1x128x128xbf16> to vector<128x128xbf16>
    %33 = vector.shape_cast %30 : vector<128x128xbf16> to vector<1x128x128xbf16>
    tpu.vector_store %arg8[%c1, %c0_22, %c0_23], %33 {strides = array<i32>} : memref<2x128x128xbf16, #tpu.memory_space<vmem>>, vector<1x128x128xbf16>,
    %34 = vector.extract_strided_slice %18 {offsets = [128, 0], sizes = [128, 128], strides = [1, 1]} : vector<256x128xf32> to vector<128x128xf32>
    %35 = arith.truncf %34 : vector<128x128xf32> to vector<128x128xbf16>
    %c1_24 = arith.constant 1 : index
    %c0_25 = arith.constant 0 : index
    %c0_26 = arith.constant 0 : index
    %36 = vector.load %arg9[%c1_24, %c0_25, %c0_26] : memref<2x128x128xbf16, #tpu.memory_space<vmem>>, vector<1x128x128xbf16>
    %37 = vector.shape_cast %36 : vector<1x128x128xbf16> to vector<128x128xbf16>
    %38 = vector.shape_cast %35 : vector<128x128xbf16> to vector<1x128x128xbf16>
    tpu.vector_store %arg9[%c1_24, %c0_25, %c0_26], %38 {strides = array<i32>} : memref<2x128x128xbf16, #tpu.memory_space<vmem>>, vector<1x128x128xbf16>,
    return
  }
  func.func @transform_0(%arg0: i32, %arg1: i32) -> (i32, i32, i32) {
    %c0_i32 = arith.constant 0 : i32
    %c0_i32_0 = arith.constant 0 : i32
    return %arg0, %arg1, %c0_i32 : i32, i32, i32
  }
  func.func @transform_1(%arg0: i32, %arg1: i32) -> (i32, i32) {
    %c0_i32 = arith.constant 0 : i32
    %c0_i32_0 = arith.constant 0 : i32
    %c0_i32_1 = arith.constant 0 : i32
    return %c0_i32, %c0_i32_0 : i32, i32
  }
  func.func @transform_2(%arg0: i32, %arg1: i32) -> (i32, i32) {
    %c0_i32 = arith.constant 0 : i32
    %c0_i32_0 = arith.constant 0 : i32
    %c0_i32_1 = arith.constant 0 : i32
    return %c0_i32, %c0_i32_0 : i32, i32
  }
  func.func @transform_3(%arg0: i32, %arg1: i32) -> (i32, i32) {
    %c0_i32 = arith.constant 0 : i32
    %c0_i32_0 = arith.constant 0 : i32
    %c0_i32_1 = arith.constant 0 : i32
    return %c0_i32, %c0_i32_0 : i32, i32
  }
  func.func @transform_4(%arg0: i32, %arg1: i32) -> (i32, i32) {
    %c0_i32 = arith.constant 0 : i32
    %c0_i32_0 = arith.constant 0 : i32
    %c0_i32_1 = arith.constant 0 : i32
    return %c0_i32, %c0_i32_0 : i32, i32
  }
  func.func @transform_5(%arg0: i32, %arg1: i32) -> (i32, i32) {
    %c0_i32 = arith.constant 0 : i32
    %c0_i32_0 = arith.constant 0 : i32
    %c0_i32_1 = arith.constant 0 : i32
    return %c0_i32, %c0_i32_0 : i32, i32
  }
  func.func @transform_6(%arg0: i32, %arg1: i32) -> (i32, i32, i32) {
    %c0_i32 = arith.constant 0 : i32
    %c0_i32_0 = arith.constant 0 : i32
    return %arg0, %arg1, %c0_i32 : i32, i32, i32
  }
  func.func @transform_7(%arg0: i32, %arg1: i32) -> (i32, i32, i32) {
    %c0_i32 = arith.constant 0 : i32
    %c0_i32_0 = arith.constant 0 : i32
    return %arg0, %arg1, %c0_i32 : i32, i32, i32
  }
}

</mosaic_0001>

<bundles_post_ra>
// kernel: tpu_custom_call.1
= control target key start
LH: loop header
LB: loop body
LE: loop exit
PB: predicated region body
PF: predicated region fallthrough
CT: control target
= control target key end

     0   :  { %13 = vsyncpa [#allocation3], 0  ;;  %s2347_s0 = inlined_call_operand.hbm [shape: bf16[2,128,128], index: 0, kind: input, shape index: {}]   ;;  %s2348_s1 = inlined_call_operand.hbm [shape: bf16[128,128], index: 1, kind: input, shape index: {}]   ;;  %s2349_s2 = inlined_call_operand.vmem [shape: f32[1,128], index: 2, kind: input, shape index: {}]   ;;  %s2350_s3 = inlined_call_operand.hbm [shape: bf16[128,128], index: 3, kind: input, shape index: {}]   ;;  %s2351_s4 = inlined_call_operand.vmem [shape: f32[1,128], index: 4, kind: input, shape index: {}]   ;;  %s2352_s5 = inlined_call_operand.hbm [shape: bf16[128,128], index: 5, kind: input, shape index: {}]   ;;  %s2353_s6 = inlined_call_operand.hbm [shape: bf16[2,128,128], index: 6, kind: output, shape index: {0}]   ;;  %s2354_s7 = inlined_call_operand.hbm [shape: bf16[2,128,128], index: 7, kind: output, shape index: {1}]  }
   0x1   :  { %14 = vsyncpa [#allocation6], 0 }
   0x2   :  { %15 = vsyncpa [#allocation9], 0 }
   0x3   :  { %16 = vsyncpa [#allocation4], 0 }
   0x4   :  { %17 = vsyncpa [#allocation12], 0  ;;  %s2117_s24 = smov [#allocation5]   ;;  %s2118_s26 = smov [#allocation2]  }
   0x5   :  { %s35_s25 = sshll.u32 %s2117_s24, 4  ;;  %s23_s27 = sshll.u32 %s2118_s26, 4  ;;  %s36_s25 = int_to_ptr.vmem [resolvable:$true] %s35_s25  ;;  %s2165_s27 = int_to_ptr.vmem [resolvable:$true] %s23_s27 }
   0x6   :  { %s1975_s30 = scalar_lea.hbm %s2348_s1, 1024 }
   0x7   :  { %p1976_p0 = scmp.ne.s32.totalorder %s2348_s1, %s1975_s30  ;;  %p1979_p1 = scmp.lt.u32.totalorder %s1975_s30, %s2348_s1 }
   0x9   :  { %p1981_p2 = pnand %p1979_p1, %p1976_p0 }
   0xb   :  { %1984 = shalt.err (!%p1981_p2)
}
   0xc   :  { %s1985_s12 = scalar_lea.vmem %s36_s25, 1024  ;;  %p1990_p4 = scmp.lt.s32.totalorder %s36_s25, %s36_s25 }
   0xd   :  { %p1986_p3 = scmp.ne.s32.totalorder %s36_s25, %s1985_s12  ;;  %p1991_p5 = scmp.lt.s32.totalorder %s1985_s12, %s1985_s12 }
   0xf   :  { %p1992_p6 = por %p1991_p5, %p1990_p4 }
  0x11   :  { %p1993_p7 = pnand %p1992_p6, %p1986_p3 }
  0x13   :  { %1996 = shalt.err (!%p1993_p7)
}
  0x14   :  { %s2119_s13 = smov 64   ;;  %s2120_s14 = smov 4  }
  0x15   :  { %41 = dma.hbm_to_vmem [thread:$0]  %s2348_s1, 1024, %s36_s25, [#allocation6], %s2119_s13, %s2119_s13, %s2120_s14  }
  0x16   :  { %s1997_s19 = scalar_lea.hbm %s2347_s0, 2048 }
  0x17   :  { %p1998_p8 = scmp.ne.s32.totalorder %s2347_s0, %s1997_s19  ;;  %p2001_p9 = scmp.lt.u32.totalorder %s1997_s19, %s2347_s0 }
  0x19   :  { %p2003_p10 = pnand %p2001_p9, %p1998_p8 }
  0x1b   :  { %2006 = shalt.err (!%p2003_p10)
}
  0x1c   :  { %s2007_s24 = scalar_lea.vmem %s2165_s27, 2048  ;;  %p2012_p12 = scmp.lt.s32.totalorder %s2165_s27, %s2165_s27 }
  0x1d   :  { %p2008_p11 = scmp.ne.s32.totalorder %s2165_s27, %s2007_s24  ;;  %p2013_p13 = scmp.lt.s32.totalorder %s2007_s24, %s2007_s24 }
  0x1f   :  { %p2014_p0 = por %p2013_p13, %p2012_p12 }
  0x21   :  { %p2015_p1 = pnand %p2014_p0, %p2008_p11 }
  0x23   :  { %2018 = shalt.err (!%p2015_p1)
}
  0x24   :  { %29 = dma.hbm_to_vmem [thread:$0]  %s2347_s0, 2048, %s2165_s27, [#allocation3], %s2119_s13, %s2119_s13, %s2120_s14  }
  0x25   :  { %s2121_s26 = smov [#allocation7]   ;;  %s2122_s29 = smov [#allocation8]  }
  0x26   :  { %s49_s28 = sshll.u32 %s2121_s26, 4  ;;  %s63_s30 = sshll.u32 %s2122_s29, 4  ;;  %s50_s28 = int_to_ptr.vmem [resolvable:$true] %s49_s28  ;;  %s2202_s30 = int_to_ptr.vmem [resolvable:$true] %s63_s30 }
  0x27   :  { %s2019_s10 = scalar_lea.hbm %s2350_s3, 1024 }
  0x28   :  { %p2020_p2 = scmp.ne.s32.totalorder %s2350_s3, %s2019_s10  ;;  %p2023_p3 = scmp.lt.u32.totalorder %s2019_s10, %s2350_s3 }
  0x2a   :  { %p2025_p4 = pnand %p2023_p3, %p2020_p2 }
  0x2c   :  { %2028 = shalt.err (!%p2025_p4)
}
  0x2d   :  { %s2029_s0 = scalar_lea.vmem %s50_s28, 1024  ;;  %p2034_p6 = scmp.lt.s32.totalorder %s50_s28, %s50_s28 }
  0x2e   :  { %p2030_p5 = scmp.ne.s32.totalorder %s50_s28, %s2029_s0  ;;  %p2035_p7 = scmp.lt.s32.totalorder %s2029_s0, %s2029_s0 }
  0x30   :  { %p2036_p8 = por %p2035_p7, %p2034_p6 }
  0x32   :  { %p2037_p9 = pnand %p2036_p8, %p2030_p5 }
  0x34   :  { %2040 = shalt.err (!%p2037_p9)
}
  0x35   :  { %55 = dma.hbm_to_vmem [thread:$0]  %s2350_s3, 1024, %s50_s28, [#allocation6], %s2119_s13, %s2119_s13, %s2120_s14  }
  0x36   :  { %s2041_s20 = scalar_lea.hbm %s2352_s5, 1024 }
  0x37   :  { %p2042_p10 = scmp.ne.s32.totalorder %s2352_s5, %s2041_s20  ;;  %p2045_p11 = scmp.lt.u32.totalorder %s2041_s20, %s2352_s5 }
  0x39   :  { %p2047_p12 = pnand %p2045_p11, %p2042_p10 }
  0x3b   :  { %2050 = shalt.err (!%p2047_p12)
}
  0x3c   :  { %s2051_s1 = scalar_lea.vmem %s2202_s30, 1024  ;;  %p2056_p0 = scmp.lt.s32.totalorder %s2202_s30, %s2202_s30 }
  0x3d   :  { %p2052_p13 = scmp.ne.s32.totalorder %s2202_s30, %s2051_s1  ;;  %p2057_p1 = scmp.lt.s32.totalorder %s2051_s1, %s2051_s1 }
  0x3f   :  { %p2058_p2 = por %p2057_p1, %p2056_p0 }
  0x41   :  { %p2059_p3 = pnand %p2058_p2, %p2052_p13 }
  0x43   :  { %2062 = shalt.err (!%p2059_p3)
}
  0x44   :  { %69 = dma.hbm_to_vmem [thread:$0]  %s2352_s5, 1024, %s2202_s30, [#allocation9], %s2119_s13, %s2119_s13, %s2120_s14  }
  0x45   :  { %2107 = dma.done.wait [#allocation3], 2048  }
  0x46   :  { %2108 = vsyncadd [#allocation3], 4294965248 }
  0x47   :  { %2109 = dma.done.wait [#allocation6], 2048  }
  0x48   :  { %2110 = vsyncadd [#allocation6], 4294965248 }
  0x49   :  { %2111 = dma.done.wait [#allocation9], 1024  }
  0x4a   :  { %2112 = vsyncadd [#allocation9], 4294966272  ;;  %v1935_v0 = vld [vmem:[#allocation5] sm:$0xff]   ;;  %v1936_v1 = vld [vmem:[#allocation5 + $0x8] sm:$0xff]  }
  0x4b   :  { %1911 = vmatprep.subr.bf16.mxu1 %v1935_v0  ;;  %1767 = vmatprep.subr.bf16.mxu0 %v1935_v0  ;;  %v1937_v2 = vld [vmem:[#allocation5 + $0x10] sm:$0xff]   ;;  %v1938_v3 = vld [vmem:[#allocation5 + $0x18] sm:$0xff]   ;;  %v2239_v4 = vld [vmem:[#allocation2 + $0x40] sm:$0xff]  }
  0x4c   :  { %1919 = vmatpush3.bf16.msra.mxu1 %v1935_v0  ;;  %1768 = vmatpush3.bf16.msra.mxu0 %v1935_v0  ;;  %v1939_v5 = vld [vmem:[#allocation5 + $0x20] sm:$0xff]   ;;  %v1940_v6 = vld [vmem:[#allocation5 + $0x28] sm:$0xff]   ;;  %v1941_v7 = vld [vmem:[#allocation5 + $0x30] sm:$0xff]  }
  0x4d   :  { %1912 = vmatprep.subr.bf16.mxu1 %v1936_v1  ;;  %1769 = vmatprep.subr.bf16.mxu0 %v1936_v1  ;;  %v1942_v8 = vld [vmem:[#allocation5 + $0x38] sm:$0xff]   ;;  %v1959_v9 = vld [vmem:[#allocation2] sm:$0xff]   ;;  %v1944_v11 = vld [vmem:[#allocation2 + $0x48] sm:$0xff]  }
  0x4e   :  { %1799 = vmatprep.mubr.bf16.mxu1 %v2239_v4  ;;  %1783 = vmatprep.mubr.bf16.mxu0 %v1959_v9  ;;  %v1945_v10 = vld [vmem:[#allocation7] sm:$0xff]   ;;  %v1946_v12 = vld [vmem:[#allocation7 + $0x8] sm:$0xff]   ;;  %v1947_v13 = vld [vmem:[#allocation2 + $0x50] sm:$0xff]  }
  0x4f   :  { %v1960_v14 = vld [vmem:[#allocation2 + $0x8] sm:$0xff]   ;;  %v1961_v15 = vld [vmem:[#allocation2 + $0x10] sm:$0xff]   ;;  %v1948_v17 = vld [vmem:[#allocation2 + $0x58] sm:$0xff]  }
  0x50   :  { %1920 = vmatpush3.bf16.msra.mxu1 %v1936_v1  ;;  %1770 = vmatpush3.bf16.msra.mxu0 %v1936_v1  ;;  %v1949_v16 = vld [vmem:[#allocation7 + $0x10] sm:$0xff]   ;;  %v1951_v18 = vld [vmem:[#allocation2 + $0x60] sm:$0xff]   ;;  %v1950_v19 = vld [vmem:[#allocation7 + $0x18] sm:$0xff]  }
  0x51   :  { %1913 = vmatprep.subr.bf16.mxu1 %v1937_v2  ;;  %1771 = vmatprep.subr.bf16.mxu0 %v1937_v2  ;;  %v1962_v20 = vld [vmem:[#allocation2 + $0x18] sm:$0xff]   ;;  %v1963_v21 = vld [vmem:[#allocation2 + $0x20] sm:$0xff]   ;;  %v1952_v23 = vld [vmem:[#allocation2 + $0x68] sm:$0xff]  }
  0x52   :  { %v1953_v22 = vld [vmem:[#allocation7 + $0x20] sm:$0xff]   ;;  %v1955_v24 = vld [vmem:[#allocation2 + $0x70] sm:$0xff]   ;;  %v1954_v25 = vld [vmem:[#allocation7 + $0x28] sm:$0xff]  }
  0x53   :  { %v1964_v26 = vld [vmem:[#allocation2 + $0x28] sm:$0xff]   ;;  %v1965_v27 = vld [vmem:[#allocation2 + $0x30] sm:$0xff]   ;;  %v1956_v29 = vld [vmem:[#allocation2 + $0x78] sm:$0xff]  }
  0x54   :  { %1921 = vmatpush3.bf16.msra.mxu1 %v1937_v2  ;;  %1772 = vmatpush3.bf16.msra.mxu0 %v1937_v2  ;;  %v1957_v28 = vld [vmem:[#allocation7 + $0x30] sm:$0xff]   ;;  %v1958_v30 = vld [vmem:[#allocation7 + $0x38] sm:$0xff]   ;;  %v1967_v32 = vld [vmem:[#allocation8] sm:$0xff]  }
  0x55   :  { %1914 = vmatprep.subr.bf16.mxu1 %v1938_v3  ;;  %1773 = vmatprep.subr.bf16.mxu0 %v1938_v3  ;;  %v1966_v31 = vld [vmem:[#allocation2 + $0x38] sm:$0xff]   ;;  %v1968_v33 = vld [vmem:[#allocation8 + $0x8] sm:$0xff]   ;;  %v1969_v34 = vld [vmem:[#allocation8 + $0x10] sm:$0xff]  }
  0x56   :  { %v1970_v35 = vld [vmem:[#allocation8 + $0x18] sm:$0xff]   ;;  %v1971_v36 = vld [vmem:[#allocation8 + $0x20] sm:$0xff]   ;;  %v1972_v37 = vld [vmem:[#allocation8 + $0x28] sm:$0xff]  }
  0x57   :  { %v1973_v38 = vld [vmem:[#allocation8 + $0x30] sm:$0xff]   ;;  %v1974_v39 = vld [vmem:[#allocation8 + $0x38] sm:$0xff]   ;;  %v2246_v40 = vld [vmem:[%s2349_s2] ss:$0 sm:$0xff] }
  0x58   :  { %1922 = vmatpush3.bf16.msra.mxu1 %v1938_v3  ;;  %1774 = vmatpush3.bf16.msra.mxu0 %v1938_v3 }
  0x59   :  { %1915 = vmatprep.subr.bf16.mxu1 %v1939_v5  ;;  %1775 = vmatprep.subr.bf16.mxu0 %v1939_v5 }
  0x5c   :  { %1923 = vmatpush3.bf16.msra.mxu1 %v1939_v5  ;;  %1776 = vmatpush3.bf16.msra.mxu0 %v1939_v5 }
  0x5d   :  { %1916 = vmatprep.subr.bf16.mxu1 %v1940_v6  ;;  %1777 = vmatprep.subr.bf16.mxu0 %v1940_v6 }
  0x60   :  { %1924 = vmatpush3.bf16.msra.mxu1 %v1940_v6  ;;  %1778 = vmatpush3.bf16.msra.mxu0 %v1940_v6 }
  0x61   :  { %1917 = vmatprep.subr.bf16.mxu1 %v1941_v7  ;;  %1779 = vmatprep.subr.bf16.mxu0 %v1941_v7 }
  0x64   :  { %1925 = vmatpush3.bf16.msra.mxu1 %v1941_v7  ;;  %1780 = vmatpush3.bf16.msra.mxu0 %v1941_v7 }
  0x65   :  { %1918 = vmatprep.subr.bf16.mxu1 %v1942_v8  ;;  %1781 = vmatprep.subr.bf16.mxu0 %v1942_v8 }
  0x68   :  { %1926 = vmatpush3.bf16.msra.mxu1 %v1942_v8  ;;  %1782 = vmatpush3.bf16.msra.mxu0 %v1942_v8 }
  0x69   :  { %1815 = vmatprep.subr.bf16.mxu1 %v1945_v10  ;;  %1863 = vmatprep.subr.bf16.mxu0 %v1967_v32 }
  0x6b   :  { %1800 = vmatmul.mubr.bf16.vlgmr.msra.gmra.mrb[0].mxu1 %v1944_v11  ;;  %1784 = vmatmul.mubr.bf16.vlgmr.msra.gmra.mrb[0].mxu0 %v1960_v14 }
  0x6c   :  { %1816 = vmatpush3.bf16.msra.mxu1 %v1945_v10  ;;  %1803 = vmatprep.mubr.bf16.mxu1 %v1947_v13 }
  0x6d   :  { %1817 = vmatprep.subr.bf16.mxu1 %v1946_v12  ;;  %1787 = vmatprep.mubr.bf16.mxu0 %v1961_v15 }
  0x6e   :  { %1864 = vmatpush3.bf16.msra.mxu0 %v1967_v32 }
  0x6f   :  { %1865 = vmatprep.subr.bf16.mxu0 %v1968_v33 }
  0x70   :  { %1818 = vmatpush3.bf16.msra.mxu1 %v1946_v12 }
  0x71   :  { %1819 = vmatprep.subr.bf16.mxu1 %v1949_v16 }
  0x72   :  { %1866 = vmatpush3.bf16.msra.mxu0 %v1968_v33 }
  0x73   :  { %1804 = vmatmul.mubr.bf16.gmra.mrb[4].mxu1 %v1948_v17  ;;  %1788 = vmatmul.mubr.bf16.gmra.mrb[4].mxu0 %v1962_v20 }
  0x74   :  { %1820 = vmatpush3.bf16.msra.mxu1 %v1949_v16  ;;  %1807 = vmatprep.mubr.bf16.mxu1 %v1951_v18 }
  0x75   :  { %1821 = vmatprep.subr.bf16.mxu1 %v1950_v19  ;;  %1791 = vmatprep.mubr.bf16.mxu0 %v1963_v21 }
  0x76   :  { %1867 = vmatprep.subr.bf16.mxu0 %v1969_v34 }
  0x77   :  { %1868 = vmatpush3.bf16.msra.mxu0 %v1969_v34 }
  0x78   :  { %1822 = vmatpush3.bf16.msra.mxu1 %v1950_v19  ;;  %1869 = vmatprep.subr.bf16.mxu0 %v1970_v35 }
  0x79   :  { %1823 = vmatprep.subr.bf16.mxu1 %v1953_v22 }
  0x7b   :  { %1808 = vmatmul.mubr.bf16.gmra.mrb[8].mxu1 %v1952_v23  ;;  %1792 = vmatmul.mubr.bf16.gmra.mrb[8].mxu0 %v1964_v26 }
  0x7c   :  { %1824 = vmatpush3.bf16.msra.mxu1 %v1953_v22  ;;  %1811 = vmatprep.mubr.bf16.mxu1 %v1955_v24 }
  0x7d   :  { %1825 = vmatprep.subr.bf16.mxu1 %v1954_v25  ;;  %1795 = vmatprep.mubr.bf16.mxu0 %v1965_v27 }
  0x7e   :  { %1870 = vmatpush3.bf16.msra.mxu0 %v1970_v35 }
  0x7f   :  { %1871 = vmatprep.subr.bf16.mxu0 %v1971_v36 }
  0x80   :  { %1826 = vmatpush3.bf16.msra.mxu1 %v1954_v25 }
  0x81   :  { %1827 = vmatprep.subr.bf16.mxu1 %v1957_v28 }
  0x82   :  { %1872 = vmatpush3.bf16.msra.mxu0 %v1971_v36 }
  0x83   :  { %1812 = vmatmul.mubr.bf16.gmra.mrb[12].mxu1 %v1956_v29  ;;  %1796 = vmatmul.mubr.bf16.gmra.mrb[12].mxu0 %v1966_v31 }
  0x84   :  { %1828 = vmatpush3.bf16.msra.mxu1 %v1957_v28  ;;  %1831 = vmatprep.mubr.bf16.mxu1 %v1959_v9 }
  0x85   :  { %1829 = vmatprep.subr.bf16.mxu1 %v1958_v30  ;;  %1873 = vmatprep.subr.bf16.mxu0 %v1972_v37 }
  0x86   :  { %1874 = vmatpush3.bf16.msra.mxu0 %v1972_v37 }
  0x87   :  { %1875 = vmatprep.subr.bf16.mxu0 %v1973_v38 }
  0x88   :  { %1830 = vmatpush3.bf16.msra.mxu1 %v1958_v30 }
  0x8a   :  { %1876 = vmatpush3.bf16.msra.mxu0 %v1973_v38 }
  0x8b   :  { %1832 = vmatmul.mubr.bf16.vlgmr.msra.gmra.mrb[16].mxu1 %v1960_v14  ;;  %1877 = vmatprep.subr.bf16.mxu0 %v1974_v39 }
  0x8c   :  { %1835 = vmatprep.mubr.bf16.mxu1 %v1961_v15 }
  0x8e   :  { %1878 = vmatpush3.bf16.msra.mxu0 %v1974_v39 }
  0x93   :  { %1836 = vmatmul.mubr.bf16.gmra.mrb[20].mxu1 %v1962_v20 }
  0x94   :  { %1839 = vmatprep.mubr.bf16.mxu1 %v1963_v21 }
  0x9b   :  { %1840 = vmatmul.mubr.bf16.gmra.mrb[24].mxu1 %v1964_v26 }
  0x9c   :  { %1843 = vmatprep.mubr.bf16.mxu1 %v1965_v27 }
  0xa3   :  { %1844 = vmatmul.mubr.bf16.gmra.mrb[28].mxu1 %v1966_v31 }
  0xa4   :  { %1847 = vmatprep.mubr.bf16.mxu1 %v2239_v4 }
  0xab   :  { %1848 = vmatmul.mubr.bf16.gmra.mrb[32].mxu1 %v1944_v11 }
  0xac   :  { %1851 = vmatprep.mubr.bf16.mxu1 %v1947_v13 }
  0xb3   :  { %1852 = vmatmul.mubr.bf16.gmra.mrb[36].mxu1 %v1948_v17 }
  0xb4   :  { %1855 = vmatprep.mubr.bf16.mxu1 %v1951_v18 }
  0xbb   :  { %1856 = vmatmul.mubr.bf16.gmra.mrb[40].mxu1 %v1952_v23 }
  0xbc   :  { %1859 = vmatprep.mubr.bf16.mxu1 %v1955_v24 }
  0xc3   :  { %1860 = vmatmul.mubr.bf16.gmra.mrb[44].mxu1 %v1956_v29 }
 0x13e   :  { %v1801_v41 = vpop.f32.mrb[0].mxu1  ;;  %v1785_v42 = vpop.f32.mrb[0].mxu0 }
 0x13f   :  { %v389_v43 = vadd.f32 %v1801_v41, %v2246_v40  ;;  %v380_v44 = vpop.f32.mrb[1].mxu1  ;;  %v325_v45 = vadd.f32 %v1785_v42, %v2246_v40  ;;  %v316_v46 = vpop.f32.mrb[1].mxu0 }
 0x140   :  { %v381_v47 = vadd.f32 %v2246_v40, %v380_v44  ;;  %v1802_v48 = vpop.f32.mrb[2].mxu1  ;;  %v317_v49 = vadd.f32 %v2246_v40, %v316_v46  ;;  %v1786_v50 = vpop.f32.mrb[2].mxu0 }
 0x141   :  { %v392_v51 = vadd.f32 %v1802_v48, %v2246_v40  ;;  %v383_v52 = vpop.f32.mrb[3].mxu1  ;;  %v445_v53 = vmax.f32 %v325_v45, 0.0  ;;  %v328_v54 = vadd.f32 %v1786_v50, %v2246_v40  ;;  %v319_v55 = vpop.f32.mrb[3].mxu0  ;;  %v461_v59 = vmax.f32 %v389_v43, 0.0 }
 0x142   :  { %v384_v56 = vadd.f32 %v2246_v40, %v383_v52  ;;  %v443_v57 = vmax.f32 %v317_v49, 0.0  ;;  %v320_v58 = vadd.f32 %v2246_v40, %v319_v55  ;;  %v459_v62 = vmax.f32 %v381_v47, 0.0 }
 0x143   :  { %v462_v60 = vmax.f32 %v392_v51, 0.0  ;;  %v446_v61 = vmax.f32 %v328_v54, 0.0 }
 0x144   :  { %v460_v63 = vmax.f32 %v384_v56, 0.0  ;;  %v444_v0 = vmax.f32 %v320_v58, 0.0 }
 0x145   :  { %v1595_v1 = vpack.c.bf16 %v462_v60, %v461_v59  ;;  %v1515_v2 = vpack.c.bf16 %v446_v61, %v445_v53 }
 0x146   :  { %v1590_v3 = vpack.c.bf16 %v460_v63, %v459_v62  ;;  %v1805_v4 = vpop.f32.mrb[4].mxu1  ;;  %v1510_v5 = vpack.c.bf16 %v444_v0, %v443_v57  ;;  %v1789_v6 = vpop.f32.mrb[4].mxu0 }
 0x147   :  { %1681 = vst [vmem:[#allocation10 + $0x48] sm:$0xff] %v1595_v1   ;;  %v405_v7 = vadd.f32 %v1805_v4, %v2246_v40  ;;  %v396_v8 = vpop.f32.mrb[5].mxu1  ;;  %1667 = vst [vmem:[#allocation10 + $0x8] sm:$0xff] %v1515_v2   ;;  %v341_v9 = vadd.f32 %v1789_v6, %v2246_v40  ;;  %v332_v10 = vpop.f32.mrb[5].mxu0 }
 0x148   :  { %1591 = vst [vmem:[#allocation10 + $0x40] sm:$0xff] %v1590_v3   ;;  %v397_v11 = vadd.f32 %v2246_v40, %v396_v8  ;;  %v1806_v12 = vpop.f32.mrb[6].mxu1  ;;  %1511 = vst [vmem:[#allocation10] sm:$0xff] %v1510_v5   ;;  %v333_v13 = vadd.f32 %v2246_v40, %v332_v10  ;;  %v1790_v14 = vpop.f32.mrb[6].mxu0 }
 0x149   :  { %v408_v15 = vadd.f32 %v1806_v12, %v2246_v40  ;;  %v399_v16 = vpop.f32.mrb[7].mxu1  ;;  %v449_v17 = vmax.f32 %v341_v9, 0.0  ;;  %v344_v18 = vadd.f32 %v1790_v14, %v2246_v40  ;;  %v335_v19 = vpop.f32.mrb[7].mxu0  ;;  %v465_v23 = vmax.f32 %v405_v7, 0.0 }
 0x14a   :  { %v400_v20 = vadd.f32 %v2246_v40, %v399_v16  ;;  %v447_v21 = vmax.f32 %v333_v13, 0.0  ;;  %v336_v22 = vadd.f32 %v2246_v40, %v335_v19  ;;  %v463_v26 = vmax.f32 %v397_v11, 0.0 }
 0x14b   :  { %v466_v24 = vmax.f32 %v408_v15, 0.0  ;;  %v450_v25 = vmax.f32 %v344_v18, 0.0 }
 0x14c   :  { %v464_v27 = vmax.f32 %v400_v20, 0.0  ;;  %v448_v28 = vmax.f32 %v336_v22, 0.0 }
 0x14d   :  { %v1605_v29 = vpack.c.bf16 %v466_v24, %v465_v23  ;;  %v1525_v30 = vpack.c.bf16 %v450_v25, %v449_v17 }
 0x14e   :  { %v1600_v31 = vpack.c.bf16 %v464_v27, %v463_v26  ;;  %v1809_v32 = vpop.f32.mrb[8].mxu1  ;;  %v1520_v33 = vpack.c.bf16 %v448_v28, %v447_v21  ;;  %v1793_v34 = vpop.f32.mrb[8].mxu0  ;;  %v2283_v21 = vld [vmem:[%s2351_s4] ss:$0 sm:$0xff]  ;;  %s2123_s4 = smov [#allocation10]  }
 0x14f   :  { %1683 = vst [vmem:[#allocation10 + $0x58] sm:$0xff] %v1605_v29   ;;  %v421_v35 = vadd.f32 %v1809_v32, %v2246_v40  ;;  %v412_v36 = vpop.f32.mrb[9].mxu1  ;;  %1669 = vst [vmem:[#allocation10 + $0x18] sm:$0xff] %v1525_v30   ;;  %v357_v37 = vadd.f32 %v1793_v34, %v2246_v40  ;;  %v348_v38 = vpop.f32.mrb[9].mxu0  ;;  %s1307_s29 = sshll.u32 %s2123_s4, 4  ;;  %s1308_s29 = int_to_ptr.vmem [resolvable:$true] %s1307_s29 }
 0x150   :  { %1682 = vst [vmem:[#allocation10 + $0x50] sm:$0xff] %v1600_v31   ;;  %v413_v39 = vadd.f32 %v2246_v40, %v412_v36  ;;  %v1810_v41 = vpop.f32.mrb[10].mxu1  ;;  %1668 = vst [vmem:[#allocation10 + $0x10] sm:$0xff] %v1520_v33   ;;  %v349_v42 = vadd.f32 %v2246_v40, %v348_v38  ;;  %v1794_v43 = vpop.f32.mrb[10].mxu0  ;;  %s2063_s30 = scalar_lea.vmem %s1308_s29, 2048  ;;  %p2068_p5 = scmp.lt.s32.totalorder %s1308_s29, %s1308_s29 }
 0x151   :  { %v424_v44 = vadd.f32 %v1810_v41, %v2246_v40  ;;  %v415_v45 = vpop.f32.mrb[11].mxu1  ;;  %v453_v46 = vmax.f32 %v357_v37, 0.0  ;;  %v360_v47 = vadd.f32 %v1794_v43, %v2246_v40  ;;  %v351_v48 = vpop.f32.mrb[11].mxu0  ;;  %v469_v52 = vmax.f32 %v421_v35, 0.0  ;;  %p2064_p4 = scmp.ne.s32.totalorder %s1308_s29, %s2063_s30  ;;  %p2069_p6 = scmp.lt.s32.totalorder %s2063_s30, %s2063_s30 }
 0x152   :  { %v416_v49 = vadd.f32 %v2246_v40, %v415_v45  ;;  %v451_v50 = vmax.f32 %v349_v42, 0.0  ;;  %v352_v51 = vadd.f32 %v2246_v40, %v351_v48  ;;  %v467_v55 = vmax.f32 %v413_v39, 0.0 }
 0x153   :  { %v470_v53 = vmax.f32 %v424_v44, 0.0  ;;  %v454_v54 = vmax.f32 %v360_v47, 0.0  ;;  %p2070_p7 = por %p2069_p6, %p2068_p5 }
 0x154   :  { %v468_v56 = vmax.f32 %v416_v49, 0.0  ;;  %v452_v57 = vmax.f32 %v352_v51, 0.0 }
 0x155   :  { %v1615_v58 = vpack.c.bf16 %v470_v53, %v469_v52  ;;  %v1535_v59 = vpack.c.bf16 %v454_v54, %v453_v46  ;;  %p2071_p8 = pnand %p2070_p7, %p2064_p4 }
 0x156   :  { %v1610_v60 = vpack.c.bf16 %v468_v56, %v467_v55  ;;  %v1813_v61 = vpop.f32.mrb[12].mxu1  ;;  %v1530_v62 = vpack.c.bf16 %v452_v57, %v451_v50  ;;  %v1797_v63 = vpop.f32.mrb[12].mxu0 }
 0x157   :  { %1685 = vst [vmem:[#allocation10 + $0x68] sm:$0xff] %v1615_v58   ;;  %v437_v0 = vadd.f32 %v1813_v61, %v2246_v40  ;;  %v428_v1 = vpop.f32.mrb[13].mxu1  ;;  %1671 = vst [vmem:[#allocation10 + $0x28] sm:$0xff] %v1535_v59   ;;  %v373_v2 = vadd.f32 %v1797_v63, %v2246_v40  ;;  %v364_v3 = vpop.f32.mrb[13].mxu0 }
 0x158   :  { %1684 = vst [vmem:[#allocation10 + $0x60] sm:$0xff] %v1610_v60   ;;  %v429_v4 = vadd.f32 %v2246_v40, %v428_v1  ;;  %v1814_v5 = vpop.f32.mrb[14].mxu1  ;;  %1670 = vst [vmem:[#allocation10 + $0x20] sm:$0xff] %v1530_v62   ;;  %v365_v6 = vadd.f32 %v2246_v40, %v364_v3  ;;  %v1798_v7 = vpop.f32.mrb[14].mxu0 }
 0x159   :  { %v440_v8 = vadd.f32 %v1814_v5, %v2246_v40  ;;  %v431_v9 = vpop.f32.mrb[15].mxu1  ;;  %v457_v10 = vmax.f32 %v373_v2, 0.0  ;;  %v376_v11 = vadd.f32 %v1798_v7, %v2246_v40  ;;  %v367_v12 = vpop.f32.mrb[15].mxu0  ;;  %v473_v16 = vmax.f32 %v437_v0, 0.0 }
 0x15a   :  { %v432_v13 = vadd.f32 %v2246_v40, %v431_v9  ;;  %v455_v14 = vmax.f32 %v365_v6, 0.0  ;;  %v368_v15 = vadd.f32 %v2246_v40, %v367_v12  ;;  %v471_v19 = vmax.f32 %v429_v4, 0.0 }
 0x15b   :  { %v474_v17 = vmax.f32 %v440_v8, 0.0  ;;  %v458_v18 = vmax.f32 %v376_v11, 0.0 }
 0x15c   :  { %v472_v20 = vmax.f32 %v432_v13, 0.0  ;;  %v456_v22 = vmax.f32 %v368_v15, 0.0 }
 0x15d   :  { %v1625_v23 = vpack.c.bf16 %v474_v17, %v473_v16  ;;  %v1545_v24 = vpack.c.bf16 %v458_v18, %v457_v10 }
 0x15e   :  { %v1620_v25 = vpack.c.bf16 %v472_v20, %v471_v19  ;;  %v1833_v26 = vpop.f32.mrb[16].mxu1  ;;  %v1540_v27 = vpack.c.bf16 %v456_v22, %v455_v14 }
 0x15f   :  { %1687 = vst [vmem:[#allocation10 + $0x78] sm:$0xff] %v1625_v23   ;;  %v589_v28 = vadd.f32 %v1833_v26, %v2283_v21  ;;  %v580_v40 = vpop.f32.mrb[17].mxu1  ;;  %1673 = vst [vmem:[#allocation10 + $0x38] sm:$0xff] %v1545_v24  }
 0x160   :  { %1686 = vst [vmem:[#allocation10 + $0x70] sm:$0xff] %v1620_v25   ;;  %v581_v29 = vadd.f32 %v2283_v21, %v580_v40  ;;  %v1834_v30 = vpop.f32.mrb[18].mxu1  ;;  %1672 = vst [vmem:[#allocation10 + $0x30] sm:$0xff] %v1540_v27  }
 0x161   :  { %v592_v31 = vadd.f32 %v1834_v30, %v2283_v21  ;;  %v583_v32 = vpop.f32.mrb[19].mxu1  ;;  %v709_v34 = vmax.f32 %v589_v28, 0.0 }
 0x162   :  { %v584_v33 = vadd.f32 %v2283_v21, %v583_v32  ;;  %v707_v36 = vmax.f32 %v581_v29, 0.0 }
 0x163   :  { %v710_v35 = vmax.f32 %v592_v31, 0.0 }
 0x164   :  { %v708_v37 = vmax.f32 %v584_v33, 0.0 }
 0x165   :  { %v740_v38 = vpack.c.bf16 %v710_v35, %v709_v34 }
 0x166   :  { %v739_v39 = vpack.c.bf16 %v708_v37, %v707_v36  ;;  %v1837_v41 = vpop.f32.mrb[20].mxu1 }
 0x167   :  { %v605_v42 = vadd.f32 %v1837_v41, %v2283_v21  ;;  %v596_v43 = vpop.f32.mrb[21].mxu1 }
 0x168   :  { %v597_v44 = vadd.f32 %v2283_v21, %v596_v43  ;;  %v1838_v45 = vpop.f32.mrb[22].mxu1  ;;  %1879 = vmatprep.mubr.bf16.mxu0 %v739_v39 }
 0x169   :  { %v608_v46 = vadd.f32 %v1838_v45, %v2283_v21  ;;  %v599_v47 = vpop.f32.mrb[23].mxu1  ;;  %1880 = vmatmul.mubr.bf16.vlgmr.msra.gmra.mrb[16].mxu0 %v740_v38  ;;  %v713_v49 = vmax.f32 %v605_v42, 0.0 }
 0x16a   :  { %v600_v48 = vadd.f32 %v2283_v21, %v599_v47  ;;  %v711_v51 = vmax.f32 %v597_v44, 0.0 }
 0x16b   :  { %v714_v50 = vmax.f32 %v608_v46, 0.0 }
 0x16c   :  { %v712_v52 = vmax.f32 %v600_v48, 0.0 }
 0x16d   :  { %v742_v53 = vpack.c.bf16 %v714_v50, %v713_v49 }
 0x16e   :  { %v741_v54 = vpack.c.bf16 %v712_v52, %v711_v51  ;;  %v1841_v55 = vpop.f32.mrb[24].mxu1 }
 0x16f   :  { %v621_v56 = vadd.f32 %v1841_v55, %v2283_v21  ;;  %v612_v57 = vpop.f32.mrb[25].mxu1 }
 0x170   :  { %v613_v58 = vadd.f32 %v2283_v21, %v612_v57  ;;  %v1842_v59 = vpop.f32.mrb[26].mxu1  ;;  %1883 = vmatprep.mubr.bf16.mxu0 %v741_v54 }
 0x171   :  { %v624_v60 = vadd.f32 %v1842_v59, %v2283_v21  ;;  %v615_v61 = vpop.f32.mrb[27].mxu1  ;;  %1884 = vmatmul.mubr.bf16.gmra.mrb[20].mxu0 %v742_v53  ;;  %v717_v63 = vmax.f32 %v621_v56, 0.0 }
 0x172   :  { %v616_v62 = vadd.f32 %v2283_v21, %v615_v61  ;;  %v715_v1 = vmax.f32 %v613_v58, 0.0 }
 0x173   :  { %v718_v0 = vmax.f32 %v624_v60, 0.0 }
 0x174   :  { %v716_v2 = vmax.f32 %v616_v62, 0.0 }
 0x175   :  { %v744_v3 = vpack.c.bf16 %v718_v0, %v717_v63 }
 0x176   :  { %v743_v4 = vpack.c.bf16 %v716_v2, %v715_v1  ;;  %v1845_v5 = vpop.f32.mrb[28].mxu1 }
 0x177   :  { %v637_v6 = vadd.f32 %v1845_v5, %v2283_v21  ;;  %v628_v7 = vpop.f32.mrb[29].mxu1 }
 0x178   :  { %v629_v8 = vadd.f32 %v2283_v21, %v628_v7  ;;  %v1846_v9 = vpop.f32.mrb[30].mxu1  ;;  %1887 = vmatprep.mubr.bf16.mxu0 %v743_v4 }
 0x179   :  { %v640_v10 = vadd.f32 %v1846_v9, %v2283_v21  ;;  %v631_v11 = vpop.f32.mrb[31].mxu1  ;;  %1888 = vmatmul.mubr.bf16.gmra.mrb[24].mxu0 %v744_v3  ;;  %v721_v13 = vmax.f32 %v637_v6, 0.0 }
 0x17a   :  { %v632_v12 = vadd.f32 %v2283_v21, %v631_v11  ;;  %v719_v15 = vmax.f32 %v629_v8, 0.0 }
 0x17b   :  { %v722_v14 = vmax.f32 %v640_v10, 0.0 }
 0x17c   :  { %v720_v16 = vmax.f32 %v632_v12, 0.0 }
 0x17d   :  { %v746_v17 = vpack.c.bf16 %v722_v14, %v721_v13 }
 0x17e   :  { %v745_v18 = vpack.c.bf16 %v720_v16, %v719_v15  ;;  %v1849_v19 = vpop.f32.mrb[32].mxu1 }
 0x17f   :  { %v653_v20 = vadd.f32 %v1849_v19, %v2283_v21  ;;  %v644_v22 = vpop.f32.mrb[33].mxu1 }
 0x180   :  { %v645_v23 = vadd.f32 %v2283_v21, %v644_v22  ;;  %v1850_v24 = vpop.f32.mrb[34].mxu1  ;;  %1891 = vmatprep.mubr.bf16.mxu0 %v745_v18 }
 0x181   :  { %v656_v25 = vadd.f32 %v1850_v24, %v2283_v21  ;;  %v647_v26 = vpop.f32.mrb[35].mxu1  ;;  %1892 = vmatmul.mubr.bf16.gmra.mrb[28].mxu0 %v746_v17  ;;  %v725_v28 = vmax.f32 %v653_v20, 0.0 }
 0x182   :  { %v648_v27 = vadd.f32 %v2283_v21, %v647_v26  ;;  %v723_v29 = vmax.f32 %v645_v23, 0.0 }
 0x183   :  { %v726_v40 = vmax.f32 %v656_v25, 0.0 }
 0x184   :  { %v724_v30 = vmax.f32 %v648_v27, 0.0 }
 0x185   :  { %v748_v31 = vpack.c.bf16 %v726_v40, %v725_v28 }
 0x186   :  { %v747_v32 = vpack.c.bf16 %v724_v30, %v723_v29  ;;  %v1853_v33 = vpop.f32.mrb[36].mxu1 }
 0x187   :  { %v669_v34 = vadd.f32 %v1853_v33, %v2283_v21  ;;  %v660_v35 = vpop.f32.mrb[37].mxu1 }
 0x188   :  { %v661_v36 = vadd.f32 %v2283_v21, %v660_v35  ;;  %v1854_v37 = vpop.f32.mrb[38].mxu1  ;;  %1895 = vmatprep.mubr.bf16.mxu0 %v747_v32 }
 0x189   :  { %v672_v38 = vadd.f32 %v1854_v37, %v2283_v21  ;;  %v663_v39 = vpop.f32.mrb[39].mxu1  ;;  %1896 = vmatmul.mubr.bf16.gmra.mrb[32].mxu0 %v748_v31  ;;  %v729_v42 = vmax.f32 %v669_v34, 0.0 }
 0x18a   :  { %v664_v41 = vadd.f32 %v2283_v21, %v663_v39  ;;  %v727_v44 = vmax.f32 %v661_v36, 0.0 }
 0x18b   :  { %v730_v43 = vmax.f32 %v672_v38, 0.0 }
 0x18c   :  { %v728_v45 = vmax.f32 %v664_v41, 0.0 }
 0x18d   :  { %v750_v46 = vpack.c.bf16 %v730_v43, %v729_v42 }
 0x18e   :  { %v749_v47 = vpack.c.bf16 %v728_v45, %v727_v44  ;;  %v1857_v48 = vpop.f32.mrb[40].mxu1 }
 0x18f   :  { %v685_v49 = vadd.f32 %v1857_v48, %v2283_v21  ;;  %v676_v50 = vpop.f32.mrb[41].mxu1 }
 0x190   :  { %v677_v51 = vadd.f32 %v2283_v21, %v676_v50  ;;  %v1858_v52 = vpop.f32.mrb[42].mxu1  ;;  %1899 = vmatprep.mubr.bf16.mxu0 %v749_v47 }
 0x191   :  { %v688_v53 = vadd.f32 %v1858_v52, %v2283_v21  ;;  %v679_v54 = vpop.f32.mrb[43].mxu1  ;;  %1900 = vmatmul.mubr.bf16.gmra.mrb[36].mxu0 %v750_v46  ;;  %v733_v56 = vmax.f32 %v685_v49, 0.0 }
 0x192   :  { %v680_v55 = vadd.f32 %v2283_v21, %v679_v54  ;;  %v731_v58 = vmax.f32 %v677_v51, 0.0 }
 0x193   :  { %v734_v57 = vmax.f32 %v688_v53, 0.0 }
 0x194   :  { %v732_v59 = vmax.f32 %v680_v55, 0.0 }
 0x195   :  { %v752_v60 = vpack.c.bf16 %v734_v57, %v733_v56 }
 0x196   :  { %v751_v61 = vpack.c.bf16 %v732_v59, %v731_v58  ;;  %v1861_v62 = vpop.f32.mrb[44].mxu1 }
 0x197   :  { %v701_v63 = vadd.f32 %v1861_v62, %v2283_v21  ;;  %v692_v0 = vpop.f32.mrb[45].mxu1 }
 0x198   :  { %v693_v1 = vadd.f32 %v2283_v21, %v692_v0  ;;  %v1862_v2 = vpop.f32.mrb[46].mxu1  ;;  %1903 = vmatprep.mubr.bf16.mxu0 %v751_v61 }
 0x199   :  { %v704_v3 = vadd.f32 %v1862_v2, %v2283_v21  ;;  %v695_v4 = vpop.f32.mrb[47].mxu1  ;;  %1904 = vmatmul.mubr.bf16.gmra.mrb[40].mxu0 %v752_v60  ;;  %v737_v6 = vmax.f32 %v701_v63, 0.0 }
 0x19a   :  { %v696_v5 = vadd.f32 %v2283_v21, %v695_v4  ;;  %v735_v8 = vmax.f32 %v693_v1, 0.0 }
 0x19b   :  { %v738_v7 = vmax.f32 %v704_v3, 0.0 }
 0x19c   :  { %v736_v9 = vmax.f32 %v696_v5, 0.0 }
 0x19d   :  { %v754_v10 = vpack.c.bf16 %v738_v7, %v737_v6 }
 0x19e   :  { %v753_v11 = vpack.c.bf16 %v736_v9, %v735_v8 }
 0x1a0   :  { %1907 = vmatprep.mubr.bf16.mxu0 %v753_v11 }
 0x1a1   :  { %1908 = vmatmul.mubr.bf16.gmra.mrb[44].mxu0 %v754_v10 }
 0x1a2   :  { %2074 = shalt.err (!%p2071_p8)
}
 0x1a3   :  { %s2075_s10 = scalar_lea.hbm %s2353_s6, 2048 }
 0x1a4   :  { %p2076_p9 = scmp.ne.s32.totalorder %s2353_s6, %s2075_s10  ;;  %p2079_p10 = scmp.lt.u32.totalorder %s2075_s10, %s2353_s6 }
 0x1a6   :  { %p2081_p11 = pnand %p2079_p10, %p2076_p9 }
 0x1a8   :  { %2084 = shalt.err (!%p2081_p11)
}
 0x1a9   :  { %1313 = dma.vmem_to_hbm [thread:$0]  %s1308_s29, 2048, %s2353_s6, [#allocation4], %s2119_s13, %s2119_s13, %s2120_s14  }
 0x1aa   :  { %s2124_s6 = smov [#allocation11]  }
 0x1ab   :  { %s1319_s17 = sshll.u32 %s2124_s6, 4  ;;  %s1320_s17 = int_to_ptr.vmem [resolvable:$true] %s1319_s17 }
 0x1ac   :  { %s2085_s18 = scalar_lea.vmem %s1320_s17, 2048  ;;  %p2090_p13 = scmp.lt.s32.totalorder %s1320_s17, %s1320_s17 }
 0x1ad   :  { %p2086_p12 = scmp.ne.s32.totalorder %s1320_s17, %s2085_s18  ;;  %p2091_p0 = scmp.lt.s32.totalorder %s2085_s18, %s2085_s18 }
 0x1af   :  { %p2092_p1 = por %p2091_p0, %p2090_p13 }
 0x1b1   :  { %p2093_p2 = pnand %p2092_p1, %p2086_p12 }
 0x23c   :  { %v1881_v21 = vpop.f32.mrb[16].mxu0 }
 0x23d   :  { %v853_v12 = vpop.f32.mrb[17].mxu0 }
 0x23e   :  { %v1882_v13 = vpop.f32.mrb[18].mxu0 }
 0x23f   :  { %v1555_v14 = vpack.c.bf16 %v1882_v13, %v1881_v21  ;;  %v856_v15 = vpop.f32.mrb[19].mxu0 }
 0x240   :  { %v1550_v16 = vpack.c.bf16 %v856_v15, %v853_v12 }
 0x241   :  { %1674 = vst [vmem:[#allocation11 + $0x8] sm:$0xff] %v1555_v14  }
 0x242   :  { %1551 = vst [vmem:[#allocation11] sm:$0xff] %v1550_v16  }
 0x244   :  { %v1885_v17 = vpop.f32.mrb[20].mxu0 }
 0x245   :  { %v869_v18 = vpop.f32.mrb[21].mxu0 }
 0x246   :  { %v1886_v19 = vpop.f32.mrb[22].mxu0 }
 0x247   :  { %v1565_v20 = vpack.c.bf16 %v1886_v19, %v1885_v17  ;;  %v872_v22 = vpop.f32.mrb[23].mxu0 }
 0x248   :  { %v1560_v23 = vpack.c.bf16 %v872_v22, %v869_v18 }
 0x249   :  { %1676 = vst [vmem:[#allocation11 + $0x18] sm:$0xff] %v1565_v20  }
 0x24a   :  { %1675 = vst [vmem:[#allocation11 + $0x10] sm:$0xff] %v1560_v23  }
 0x24c   :  { %v1889_v24 = vpop.f32.mrb[24].mxu0 }
 0x24d   :  { %v885_v25 = vpop.f32.mrb[25].mxu0 }
 0x24e   :  { %v1890_v26 = vpop.f32.mrb[26].mxu0 }
 0x24f   :  { %v1575_v27 = vpack.c.bf16 %v1890_v26, %v1889_v24  ;;  %v888_v28 = vpop.f32.mrb[27].mxu0 }
 0x250   :  { %v1570_v40 = vpack.c.bf16 %v888_v28, %v885_v25 }
 0x251   :  { %1678 = vst [vmem:[#allocation11 + $0x28] sm:$0xff] %v1575_v27  }
 0x252   :  { %1677 = vst [vmem:[#allocation11 + $0x20] sm:$0xff] %v1570_v40  }
 0x254   :  { %v1893_v29 = vpop.f32.mrb[28].mxu0 }
 0x255   :  { %v901_v30 = vpop.f32.mrb[29].mxu0 }
 0x256   :  { %v1894_v31 = vpop.f32.mrb[30].mxu0 }
 0x257   :  { %v1585_v32 = vpack.c.bf16 %v1894_v31, %v1893_v29  ;;  %v904_v33 = vpop.f32.mrb[31].mxu0 }
 0x258   :  { %v1580_v34 = vpack.c.bf16 %v904_v33, %v901_v30 }
 0x259   :  { %1680 = vst [vmem:[#allocation11 + $0x38] sm:$0xff] %v1585_v32  }
 0x25a   :  { %1679 = vst [vmem:[#allocation11 + $0x30] sm:$0xff] %v1580_v34  }
 0x25c   :  { %v1897_v35 = vpop.f32.mrb[32].mxu0 }
 0x25d   :  { %v917_v36 = vpop.f32.mrb[33].mxu0 }
 0x25e   :  { %v1898_v37 = vpop.f32.mrb[34].mxu0 }
 0x25f   :  { %v1635_v38 = vpack.c.bf16 %v1898_v37, %v1897_v35  ;;  %v920_v39 = vpop.f32.mrb[35].mxu0 }
 0x260   :  { %v1630_v41 = vpack.c.bf16 %v920_v39, %v917_v36 }
 0x261   :  { %1688 = vst [vmem:[#allocation11 + $0x48] sm:$0xff] %v1635_v38  }
 0x262   :  { %1631 = vst [vmem:[#allocation11 + $0x40] sm:$0xff] %v1630_v41  }
 0x264   :  { %v1901_v42 = vpop.f32.mrb[36].mxu0 }
 0x265   :  { %v933_v43 = vpop.f32.mrb[37].mxu0 }
 0x266   :  { %v1902_v44 = vpop.f32.mrb[38].mxu0 }
 0x267   :  { %v1645_v45 = vpack.c.bf16 %v1902_v44, %v1901_v42  ;;  %v936_v46 = vpop.f32.mrb[39].mxu0 }
 0x268   :  { %v1640_v47 = vpack.c.bf16 %v936_v46, %v933_v43 }
 0x269   :  { %1690 = vst [vmem:[#allocation11 + $0x58] sm:$0xff] %v1645_v45  }
 0x26a   :  { %1689 = vst [vmem:[#allocation11 + $0x50] sm:$0xff] %v1640_v47  }
 0x26c   :  { %v1905_v48 = vpop.f32.mrb[40].mxu0 }
 0x26d   :  { %v949_v49 = vpop.f32.mrb[41].mxu0 }
 0x26e   :  { %v1906_v50 = vpop.f32.mrb[42].mxu0 }
 0x26f   :  { %v1655_v51 = vpack.c.bf16 %v1906_v50, %v1905_v48  ;;  %v952_v52 = vpop.f32.mrb[43].mxu0 }
 0x270   :  { %v1650_v53 = vpack.c.bf16 %v952_v52, %v949_v49 }
 0x271   :  { %1692 = vst [vmem:[#allocation11 + $0x68] sm:$0xff] %v1655_v51  }
 0x272   :  { %1691 = vst [vmem:[#allocation11 + $0x60] sm:$0xff] %v1650_v53  }
 0x274   :  { %v1909_v54 = vpop.f32.mrb[44].mxu0 }
 0x275   :  { %v965_v55 = vpop.f32.mrb[45].mxu0 }
 0x276   :  { %v1910_v56 = vpop.f32.mrb[46].mxu0 }
 0x277   :  { %v1665_v57 = vpack.c.bf16 %v1910_v56, %v1909_v54  ;;  %v968_v58 = vpop.f32.mrb[47].mxu0 }
 0x278   :  { %v1660_v59 = vpack.c.bf16 %v968_v58, %v965_v55 }
 0x279   :  { %1694 = vst [vmem:[#allocation11 + $0x78] sm:$0xff] %v1665_v57  }
 0x27a   :  { %1693 = vst [vmem:[#allocation11 + $0x70] sm:$0xff] %v1660_v59  }
 0x27b   :  { %2096 = shalt.err (!%p2093_p2)
}
 0x27c   :  { %s2097_s21 = scalar_lea.hbm %s2354_s7, 2048 }
 0x27d   :  { %p2098_p3 = scmp.ne.s32.totalorder %s2354_s7, %s2097_s21  ;;  %p2101_p4 = scmp.lt.u32.totalorder %s2097_s21, %s2354_s7 }
 0x27f   :  { %p2103_p5 = pnand %p2101_p4, %p2098_p3 }
 0x281   :  { %2106 = shalt.err (!%p2103_p5)
}
 0x282   :  { %1325 = dma.vmem_to_hbm [thread:$0]  %s1320_s17, 2048, %s2354_s7, [#allocation12], %s2119_s13, %s2119_s13, %s2120_s14  }
 0x283   :  { %2113 = dma.done.wait [#allocation4], 2048  }
 0x284   :  { %2114 = vsyncadd [#allocation4], 4294965248 }
 0x285   :  { %2115 = dma.done.wait [#allocation12], 2048  }
 0x286   :  { %2116 = vsyncadd [#allocation12], 4294965248 }
 0x287   :  { %1332 = vsyncpa [#allocation3], 1 }
 0x288   :  { %1333 = vsyncpa [#allocation6], 1 }
 0x289   :  { %1334 = vsyncpa [#allocation9], 1 }
 0x28a   :  { %1335 = vsyncpa [#allocation4], 1 }
 0x28b   :  { %1336 = vsyncpa [#allocation12], 1 }

</bundles_post_ra>
